<compile_context>
chip_gen: v7x
topology: tpu7x:2x2x1
jax: 0.10.0
libtpu: 0.0.40
codegen_flags: <defaults>
</compile_context>

<pallas_src>
import functools

import jax
import jax.numpy as jnp
from jax import lax
from jax.experimental import pallas as pl
from jax.experimental.pallas import tpu as pltpu

_LANE = 128
_ROWS3_TARGET = 384     # (tho * wq) rows per 3x3-conv tile (keeps acc small)
_TN3_TARGET = 256       # Cout tile for the 3x3 conv
_ROW_CAP = 2048         # max matmul rows per 1x1-conv grid step


def _pick_vmem_limit():
    """Scoped-VMEM request: half of physical, clamped to [32, 96] MiB."""
    try:
        cap = getattr(pltpu.get_tpu_info(), "vmem_capacity_bytes", None)
    except Exception:
        cap = None
    if not cap:
        return 32 * 1024 * 1024
    return int(min(96 * 1024 * 1024, max(32 * 1024 * 1024, cap // 2)))


_VMEM_LIMIT = _pick_vmem_limit()
_PW_BUDGET = max(12 * 1024 * 1024, int(_VMEM_LIMIT * 0.6))


def _ceil_to(n, m):
    return -(-n // m) * m


def _divisors_desc(n):
    return [d for d in range(n, 0, -1) if n % d == 0]


def _pick_tn(cout, target):
    for t in range(min(target, cout), 0, -_LANE):
        if cout % t == 0:
            return t
    return cout


def _pick_row_tile(ho, wq, target):
    for d in _divisors_desc(ho):
        if d * wq <= target:
            return d
    return 1


def _fit_pointwise_tiles(R, W, k0, cout, k1, has_res, out_bytes):
    """(row-tile, Cout-tile) for the fused 1x1 kernel.  Prefers tn == Cout
    (weights stay VMEM resident, activations read from HBM exactly once) and
    the largest row tile that fits the budget while leaving >= 2 grid steps on
    the row axis for megacore sharding."""
    def cost(tr, tn):
        rows = tr * W
        c = rows * k0 * 2 + k0 * tn * 2 + tn * 4          # a, w, b
        if k1:
            c += rows * k1 * 2 + k1 * tn * 2 + tn * 4     # a2, w2, b2
        if has_res:
            c += rows * tn * 2                            # residual
        c += rows * tn * out_bytes                        # output block
        c *= 2                                            # double buffering
        c += rows * tn * 4                                # f32 accumulator
        return c

    tn_cands = [t for t in range(cout, 0, -_LANE) if cout % t == 0] or [cout]
    for tn in tn_cands:
        fits = [d for d in _divisors_desc(R)
                if d * W <= _ROW_CAP and cost(d, tn) <= _PW_BUDGET]
        if fits:
            multi = [d for d in fits if R // d >= 2]
            return (max(multi) if multi else fits[0]), tn
    return 1, (_LANE if cout % _LANE == 0 else cout)


# ----------------------------------------------------------------------------
# Fused 1x1 conv (+ optional projection matmul or identity residual) kernel
# ----------------------------------------------------------------------------
def _pointwise_kernel(*refs, relu, second_mm, has_res):
    """out = maybe_relu(A@W + b [+ A2@W2 + b2] [+ residual])."""
    a_ref, w_ref, b_ref = refs[0], refs[1], refs[2]
    idx = 3
    if second_mm:
        a2_ref, w2_ref, b2_ref = refs[3], refs[4], refs[5]
        idx = 6
    if has_res:
        res_ref = refs[idx]
        idx += 1
    o_ref = refs[idx]

    tr, wcols, k0 = a_ref.shape
    rows = tr * wcols
    acc = jnp.dot(a_ref[...].reshape(rows, k0), w_ref[...],
                  preferred_element_type=jnp.float32)
    acc = acc + b_ref[...].astype(jnp.float32)
    if second_mm:
        k1 = a2_ref.shape[-1]
        acc = acc + jnp.dot(a2_ref[...].reshape(rows, k1), w2_ref[...],
                            preferred_element_type=jnp.float32)
        acc = acc + b2_ref[...].astype(jnp.float32)
    if has_res:
        acc = acc + res_ref[...].reshape(rows, -1).astype(jnp.float32)
    if relu:
        acc = jnp.maximum(acc, 0.0)
    o_ref[...] = acc.reshape(tr, wcols, -1).astype(o_ref.dtype)


def pointwise_conv(a, w, b, *, relu, a2=None, w2=None, b2=None,
                   residual=None, out_dtype=jnp.bfloat16):
    """Fused 1x1-conv-as-matmul on a row-structured layout.

    a        : (R, W, K0) bf16   (R = batch*rows, W = image width)
    w, b     : (K0, Cout) bf16 / (1, Cout) f32  (BN already folded in)
    a2/w2/b2 : optional second matmul (projection shortcut); a2 is either
               (R, W, K1) or the strided phase view (R, s, W, s*K1) from which
               phase (0, 0) / the first K1 channels are picked by BlockSpec.
    residual : optional (R, W, Cout) bf16 identity-shortcut tensor.
    """
    R, W, k0 = a.shape
    cout = w.shape[1]
    k1 = 0 if w2 is None else w2.shape[0]
    second_mm = a2 is not None
    has_res = residual is not None
    tr, tn = _fit_pointwise_tiles(R, W, k0, cout, k1, has_res,
                                  jnp.dtype(out_dtype).itemsize)
    gm, gn = R // tr, cout // tn

    inputs = [a, w, b]
    in_specs = [
        pl.BlockSpec((tr, W, k0), lambda mi, j: (mi, 0, 0)),
        pl.BlockSpec((k0, tn), lambda mi, j: (0, j)),
        pl.BlockSpec((1, tn), lambda mi, j: (0, j)),
    ]
    if second_mm:
        inputs += [a2, w2, b2]
        if a2.ndim == 4:   # strided shortcut view: spatial phase (0, 0)
            in_specs.append(pl.BlockSpec((tr, 1, W, k1),
                                         lambda mi, j: (mi, 0, 0, 0)))
        else:
            in_specs.append(pl.BlockSpec((tr, W, k1), lambda mi, j: (mi, 0, 0)))
        in_specs += [
            pl.BlockSpec((k1, tn), lambda mi, j: (0, j)),
            pl.BlockSpec((1, tn), lambda mi, j: (0, j)),
        ]
    if has_res:
        inputs.append(residual)
        in_specs.append(pl.BlockSpec((tr, W, tn), lambda mi, j: (mi, 0, j)))

    kern = functools.partial(_pointwise_kernel, relu=relu,
                             second_mm=second_mm, has_res=has_res)
    return pl.pallas_call(
        kern,
        out_shape=jax.ShapeDtypeStruct((R, W, cout), out_dtype),
        grid=(gm, gn),
        in_specs=in_specs,
        out_specs=pl.BlockSpec((tr, W, tn), lambda mi, j: (mi, 0, j)),
        compiler_params=pltpu.CompilerParams(
            dimension_semantics=("parallel", "parallel"),
            vmem_limit_bytes=_VMEM_LIMIT),
    )(*inputs)


# ----------------------------------------------------------------------------
# 3x3 conv (stride) + folded BN + ReLU
# ----------------------------------------------------------------------------
def _conv3x3_kernel(x_ref, w_ref, b_ref, o_ref, *, stride, tho, wo, wq, hq):
    """x_ref : (1, s*s*hq*wq, Cin)  phase-decomposed padded image (bf16)
       w_ref : (9, Cin, tn)         folded 3x3 weights
       b_ref : (1, tn)              folded BN bias
       o_ref : (tho, wo, tn)        output row-tile
    The 9 taps are accumulated in a (tho*wq, tn) f32 accumulator computed at
    full padded width wq; the extra columns are trimmed before the store."""
    i = pl.program_id(2)
    ho0 = i * tho
    rows = tho * wq
    tn = o_ref.shape[-1]
    acc = jnp.zeros((rows, tn), jnp.float32)
    for dy in range(3):
        py, oy = dy % stride, dy // stride
        for dx in range(3):
            px, ox = dx % stride, dx // stride
            start = ((py * stride + px) * hq + ho0 + oy) * wq + ox
            a = x_ref[0, pl.ds(start, rows), :]          # (rows, Cin) bf16
            acc = acc + jnp.dot(a, w_ref[dy * 3 + dx],
                                preferred_element_type=jnp.float32)
    acc = acc + b_ref[...].astype(jnp.float32)
    out = jnp.maximum(acc, 0.0).reshape(tho, wq, tn)[:, :wo, :]
    o_ref[...] = out.astype(o_ref.dtype)


def conv3x3_bn_relu(x_img, w_taps, bias, stride):
    """x_img: (N, H, W, Cin) bf16 (Cin % 128 == 0) -> ((N*Ho, Wo, Cout) bf16, Ho, Wo)."""
    n, h, w, c = x_img.shape
    cout = w_taps.shape[-1]
    s = stride
    ho = (h - 1) // s + 1
    wo = (w - 1) // s + 1
    hp, wp = h + 2, w + 2
    hq = -(-hp // s) + 1      # +1 slack row per phase bounds the tap pl.ds reads
    wq = -(-wp // s)

    # Wrapper-side layout prep (one XLA pass over conv2's input, the smallest
    # activation in the block): zero-pad border + phase-decompose the stride so
    # every (dy, dx) tap becomes a contiguous in-kernel slice of ONE slab.
    xp = jnp.pad(x_img, ((0, 0), (1, hq * s - h - 1), (1, wq * s - w - 1), (0, 0)))
    if s == 1:
        xflat = xp.reshape(n, hq * wq, c)
    else:
        xflat = (xp.reshape(n, hq, s, wq, s, c)
                   .transpose(0, 2, 4, 1, 3, 5)
                   .reshape(n, s * s * hq * wq, c))
    L = xflat.shape[1]

    tho = _pick_row_tile(ho, wq, _ROWS3_TARGET)
    gi = ho // tho
    tn = _pick_tn(cout, _TN3_TARGET)
    gj = cout // tn
    # TODO(synk): for very large feature maps the whole-image slab below should
    # be row-tiled via manual DMA double-buffering instead of staying resident.

    kern = functools.partial(_conv3x3_kernel, stride=s, tho=tho, wo=wo,
                             wq=wq, hq=hq)
    out = pl.pallas_call(
        kern,
        out_shape=jax.ShapeDtypeStruct((n * ho, wo, cout), jnp.bfloat16),
        grid=(n, gj, gi),
        in_specs=[
            pl.BlockSpec((1, L, c), lambda b, j, i: (b, 0, 0)),
            pl.BlockSpec((9, c, tn), lambda b, j, i: (0, 0, j)),
            pl.BlockSpec((1, tn), lambda b, j, i: (0, j)),
        ],
        out_specs=pl.BlockSpec((tho, wo, tn),
                               lambda b, j, i, gi=gi: (b * gi + i, 0, j)),
        compiler_params=pltpu.CompilerParams(
            dimension_semantics=("parallel", "parallel", "parallel"),
            vmem_limit_bytes=_VMEM_LIMIT),
    )(xflat, w_taps, bias)
    return out, ho, wo


# ----------------------------------------------------------------------------
# Bottleneck forward (matches PyTorch: 1x1 -> 3x3 -> 1x1, expansion 4)
# ----------------------------------------------------------------------------
def bottleneck_forward(x_nchw, kp, *, stride, out_channels):
    cin_p, p_p = kp["w1"].shape
    c4_p = kp["w3"].shape[1]
    n, cin, h, w = x_nchw.shape

    # NCHW -> NHWC, channel pad to a lane-dense multiple of 128, cast bf16.
    x = jnp.transpose(x_nchw, (0, 2, 3, 1))
    x = jnp.pad(x, ((0, 0), (0, 0), (0, 0), (0, cin_p - cin))).astype(jnp.bfloat16)

    # conv1 (1x1) + bn1 + relu
    h1 = pointwise_conv(x.reshape(n * h, w, cin_p), kp["w1"], kp["b1"], relu=True)

    # conv2 (3x3, stride) + bn2 + relu
    h2, ho, wo = conv3x3_bn_relu(h1.reshape(n, h, w, p_p), kp["w2"], kp["b2"],
                                 stride)

    # conv3 (1x1) + bn3, fused with the shortcut, + final relu
    if "wsc" in kp:
        if stride == 1:
            xs = x.reshape(n * h, w, cin_p)
        elif h % stride == 0 and w % stride == 0:
            # Strided projection input folded into the conv3 kernel through a
            # free-reshape phase view; the BlockSpec selects phase (0, 0).
            xs = x.reshape(n * ho, stride, wo, stride * cin_p)
        else:
            # TODO(synk): odd spatial dims -> wrapper-side gather fallback.
            xs = x[:, ::stride, ::stride, :].reshape(n * ho, wo, cin_p)
        out = pointwise_conv(h2, kp["w3"], kp["b3"], relu=True,
                             a2=xs, w2=kp["wsc"], b2=kp["bsc"])
    else:
        # identity shortcut (stride == 1 and Cin == 4*planes): fused residual.
        out = pointwise_conv(h2, kp["w3"], kp["b3"], relu=True,
                             residual=x.reshape(n * h, w, cin_p))

    out = out.reshape(n, ho, wo, c4_p)[..., :out_channels]
    return jnp.transpose(out, (0, 3, 1, 2)).astype(jnp.float32)


# ----------------------------------------------------------------------------
# Parameters: deterministic init, BN folding, channel padding, bf16 cast
# ----------------------------------------------------------------------------
def init_raw_params(key, in_planes, planes, stride, expansion=4):
    ks = list(jax.random.split(key, 8))

    def conv_w(k, kh, kw, cin, cout):
        fan = kh * kw * cin
        return (jax.random.normal(k, (kh, kw, cin, cout)) *
                (2.0 / fan) ** 0.5).astype(jnp.float32)

    def bn_stats(k, c):
        k1, k2, k3, k4 = jax.random.split(k, 4)
        return dict(
            gamma=(1.0 + 0.1 * jax.random.normal(k1, (c,))).astype(jnp.float32),
            beta=(0.1 * jax.random.normal(k2, (c,))).astype(jnp.float32),
            mean=(0.1 * jax.random.normal(k3, (c,))).astype(jnp.float32),
            var=(0.5 + jax.random.uniform(k4, (c,))).astype(jnp.float32))

    p = {
        "w1": conv_w(ks[0], 1, 1, in_planes, planes), "bn1": bn_stats(ks[1], planes),
        "w2": conv_w(ks[2], 3, 3, planes, planes), "bn2": bn_stats(ks[3], planes),
        "w3": conv_w(ks[4], 1, 1, planes, expansion * planes),
        "bn3": bn_stats(ks[5], expansion * planes),
    }
    if stride != 1 or in_planes != expansion * planes:
        p["wsc"] = conv_w(ks[6], 1, 1, in_planes, expansion * planes)
        p["bnsc"] = bn_stats(ks[7], expansion * planes)
    return p


def fold_params(raw, eps=1e-5):
    """Fold inference BatchNorm into the conv weights: y = conv(x)*s + b."""
    def fold(w_hwio, bn):
        s = bn["gamma"] / jnp.sqrt(bn["var"] + eps)
        return w_hwio * s[None, None, None, :], bn["beta"] - bn["mean"] * s

    f = {}
    f["w1"], f["b1"] = fold(raw["w1"], raw["bn1"])
    f["w2"], f["b2"] = fold(raw["w2"], raw["bn2"])
    f["w3"], f["b3"] = fold(raw["w3"], raw["bn3"])
    if "wsc" in raw:
        f["wsc"], f["bsc"] = fold(raw["wsc"], raw["bnsc"])
    return f


def prepare_kernel_params(folded, in_planes, planes, expansion=4):
    """Pad channels to multiples of 128 (lane-dense) and cast weights to bf16."""
    cin_p = _ceil_to(in_planes, _LANE)
    p_p = _ceil_to(planes, _LANE)
    c4_p = _ceil_to(expansion * planes, _LANE)

    def pad_mat(w2d, rp, cp):
        r, c = w2d.shape
        return jnp.pad(w2d, ((0, rp - r), (0, cp - c))).astype(jnp.bfloat16)

    def pad_bias(b, cp):
        return jnp.pad(b, (0, cp - b.shape[0])).reshape(1, cp).astype(jnp.float32)

    kp = {
        "w1": pad_mat(folded["w1"].reshape(in_planes, planes), cin_p, p_p),
        "b1": pad_bias(folded["b1"], p_p),
        "w2": jnp.pad(folded["w2"],
                      ((0, 0), (0, 0), (0, p_p - planes), (0, p_p - planes))
                      ).reshape(9, p_p, p_p).astype(jnp.bfloat16),
        "b2": pad_bias(folded["b2"], p_p),
        "w3": pad_mat(folded["w3"].reshape(planes, expansion * planes), p_p, c4_p),
        "b3": pad_bias(folded["b3"], c4_p),
    }
    if "wsc" in folded:
        kp["wsc"] = pad_mat(folded["wsc"].reshape(in_planes, expansion * planes),
                            cin_p, c4_p)
        kp["bsc"] = pad_bias(folded["bsc"], c4_p)
    return kp


# ----------------------------------------------------------------------------
# Pure-XLA reference with matching numerics (bf16 operands, f32 accumulation)
# ----------------------------------------------------------------------------
def _ref_conv(x_bf16, w_hwio, bias, stride, pad):
    y = lax.conv_general_dilated(
        x_bf16, w_hwio.astype(jnp.bfloat16),
        window_strides=(stride, stride),
        padding=((pad, pad), (pad, pad)),
        dimension_numbers=("NHWC", "HWIO", "NHWC"),
        preferred_element_type=jnp.float32)
    return y + bias


def reference_forward(x_nchw, folded, stride):
    x = jnp.transpose(x_nchw, (0, 2, 3, 1)).astype(jnp.bfloat16)
    h1 = jnp.maximum(_ref_conv(x, folded["w1"], folded["b1"], 1, 0), 0.0)
    h2 = jnp.maximum(_ref_conv(h1.astype(jnp.bfloat16), folded["w2"], folded["b2"],
                               stride, 1), 0.0)
    h3 = _ref_conv(h2.astype(jnp.bfloat16), folded["w3"], folded["b3"], 1, 0)
    if "wsc" in folded:
        sc = _ref_conv(x, folded["wsc"], folded["bsc"], stride, 0)
    else:
        sc = x.astype(jnp.float32)
    out = jnp.maximum(h3 + sc, 0.0)
    return jnp.transpose(out, (0, 3, 1, 2))


# ----------------------------------------------------------------------------
if __name__ == "__main__":
    key = jax.random.PRNGKey(0)
    n, h, w = 2, 16, 16
    configs = [
        (64, 32, 2),    # projection shortcut (stride 2, channel change)
        (128, 32, 1),   # identity shortcut  (stride 1, in_planes == 4*planes)
    ]
    for ci, (in_planes, planes, stride) in enumerate(configs):
        kparam, kx = jax.random.split(jax.random.fold_in(key, ci))
        raw = init_raw_params(kparam, in_planes, planes, stride)
        folded = fold_params(raw)
        kp = prepare_kernel_params(folded, in_planes, planes)
        x = jax.random.normal(kx, (n, in_planes, h, w), dtype=jnp.float32)

        y = jax.block_until_ready(
            bottleneck_forward(x, kp, stride=stride, out_channels=4 * planes))
        y_ref = jax.block_until_ready(reference_forward(x, folded, stride))

        assert y.shape == y_ref.shape, (y.shape, y_ref.shape)
        assert bool(jnp.all(jnp.isfinite(y)))
        err = float(jnp.max(jnp.abs(y - y_ref)))
        scale = float(jnp.max(jnp.abs(y_ref)))
        assert err <= 2e-2 * max(1.0, scale), (
            f"config {ci}: max abs err {err:.4e} (ref max {scale:.3e})")
    print("KERNEL_OK")
</pallas_src>

<mosaic_0001>
module attributes {stable_mosaic.version = 11 : i64} {
  func.func @_pointwise_kernel(%arg0: i32, %arg1: i32, %arg2: memref<16x16x128xbf16, #tpu.memory_space<vmem>>, %arg3: memref<128x128xbf16, #tpu.memory_space<vmem>>, %arg4: memref<1x128xf32, #tpu.memory_space<vmem>>, %arg5: memref<16x16x128xbf16, #tpu.memory_space<vmem>>) attributes {dimension_semantics = [#tpu.dimension_semantics<parallel>, #tpu.dimension_semantics<parallel>], iteration_bounds = array<i64: 2, 1>, scalar_prefetch = 0 : i64, scratch_operands = 0 : i64, tpu.core_type = #tpu.core_type<tc>, window_params = [{transform_indices = @transform_0, window_bounds = array<i64: 16, 16, 128>}, {transform_indices = @transform_1, window_bounds = array<i64: 128, 128>}, {transform_indices = @transform_2, window_bounds = array<i64: 1, 128>}, {transform_indices = @transform_3, window_bounds = array<i64: 16, 16, 128>}]} {
    %c0 = arith.constant 0 : index
    %c0_0 = arith.constant 0 : index
    %c0_1 = arith.constant 0 : index
    %0 = vector.load %arg2[%c0, %c0_0, %c0_1] : memref<16x16x128xbf16, #tpu.memory_space<vmem>>, vector<16x16x128xbf16>
    %1 = vector.shape_cast %0 : vector<16x16x128xbf16> to vector<256x128xbf16>
    %c0_2 = arith.constant 0 : index
    %c0_3 = arith.constant 0 : index
    %2 = vector.load %arg3[%c0_2, %c0_3] : memref<128x128xbf16, #tpu.memory_space<vmem>>, vector<128x128xbf16>
    %cst = arith.constant dense<0.000000e+00> : vector<256x128xf32>
    %3 = tpu.matmul %1, %2, %cst {dimension_numbers = #tpu.dot_dimension_numbers<[1], [0], [0], [1], [0, 0, 1, 1], [], []>} : vector<256x128xbf16>, vector<128x128xbf16>, vector<256x128xf32> -> vector<256x128xf32>
    %c0_4 = arith.constant 0 : index
    %c0_5 = arith.constant 0 : index
    %4 = vector.load %arg4[%c0_4, %c0_5] : memref<1x128xf32, #tpu.memory_space<vmem>>, vector<1x128xf32>
    %5 = vector.broadcast %4 : vector<1x128xf32> to vector<256x128xf32>
    %6 = arith.addf %3, %5 : vector<256x128xf32>
    %cst_6 = arith.constant 0.000000e+00 : f32
    %7 = vector.broadcast %cst_6 : f32 to vector<256x128xf32>
    %8 = arith.maximumf %6, %7 : vector<256x128xf32>
    %9 = vector.shape_cast %8 : vector<256x128xf32> to vector<16x16x128xf32>
    %10 = arith.truncf %9 : vector<16x16x128xf32> to vector<16x16x128xbf16>
    %c0_7 = arith.constant 0 : index
    %c0_8 = arith.constant 0 : index
    %c0_9 = arith.constant 0 : index
    %11 = vector.load %arg5[%c0_7, %c0_8, %c0_9] : memref<16x16x128xbf16, #tpu.memory_space<vmem>>, vector<16x16x128xbf16>
    tpu.vector_store %arg5[%c0_7, %c0_8, %c0_9], %10 {strides = array<i32>} : memref<16x16x128xbf16, #tpu.memory_space<vmem>>, vector<16x16x128xbf16>,
    return
  }
  func.func @transform_0(%arg0: i32, %arg1: i32) -> (i32, i32, i32) {
    %c0_i32 = arith.constant 0 : i32
    %c0_i32_0 = arith.constant 0 : i32
    %c0_i32_1 = arith.constant 0 : i32
    return %arg0, %c0_i32, %c0_i32_0 : i32, i32, i32
  }
  func.func @transform_1(%arg0: i32, %arg1: i32) -> (i32, i32) {
    %c0_i32 = arith.constant 0 : i32
    %c0_i32_0 = arith.constant 0 : i32
    return %c0_i32, %arg1 : i32, i32
  }
  func.func @transform_2(%arg0: i32, %arg1: i32) -> (i32, i32) {
    %c0_i32 = arith.constant 0 : i32
    %c0_i32_0 = arith.constant 0 : i32
    return %c0_i32, %arg1 : i32, i32
  }
  func.func @transform_3(%arg0: i32, %arg1: i32) -> (i32, i32, i32) {
    %c0_i32 = arith.constant 0 : i32
    %c0_i32_0 = arith.constant 0 : i32
    return %arg0, %c0_i32, %arg1 : i32, i32, i32
  }
}

</mosaic_0001>

<bundles_post_ra>
// kernel: tpu_custom_call.1
= control target key start
LH: loop header
LB: loop body
LE: loop exit
PB: predicated region body
PF: predicated region fallthrough
CT: control target
= control target key end

     0   :  { %8 = vsyncpa [#allocation3], 0  ;;  %s1791_s0 = inlined_call_operand.hbm [shape: bf16[32,16,128], index: 0, kind: input, shape index: {}]   ;;  %s1792_s1 = inlined_call_operand.hbm [shape: bf16[128,128], index: 1, kind: input, shape index: {}]   ;;  %s1793_s2 = inlined_call_operand.vmem [shape: f32[1,128], index: 2, kind: input, shape index: {}]   ;;  %s1794_s3 = inlined_call_operand.hbm [shape: bf16[32,16,128], index: 3, kind: output, shape index: {}]  }
   0x1   :  { %10 = vsyncpa [#allocation3 + $0x1], 0 }
   0x2   :  { %11 = vsyncpa [#allocation6], 0 }
   0x3   :  { %12 = vsyncpa [#allocation4], 0 }
   0x4   :  { %14 = vsyncpa [#allocation4 + $0x1], 0  ;;  %s1488_s12 = smov 0   ;;  %s1490_s13 = smov 0  }
   0x5   :  { %s1492_s14 = smov 0   ;;  %s1494_s15 = smov 0  }
   0x6   :  { %s1496_s16 = smov 0   ;;  %s1498_s17 = smov 0  }
   0x7 LB: > { %s918_s18 = sadd.s32 4294967295, %s1459_s17   ;;  %s919_s19 = sadd.s32 4294967294, %s1459_s17   ;;  %s1459_s17 = sphi %s1498_s17, %s20_s17   ;;  %s1455_s16 = sphi %s1496_s16, %s1818_s16   ;;  %s1451_s15 = sphi %s1494_s15, %s1817_s15   ;;  %s1447_s14 = sphi %s1492_s14, %s1816_s14   ;;  %s1443_s13 = sphi %s1490_s13, %s1815_s13   ;;  %s1439_s12 = sphi %s1488_s12, %s1814_s12  }
   0x8   : > { %p52_p0 = scmp.ne.s32.totalorder %s1443_s13, %s1439_s12  ;;  %p1522_p1 = scmp.eq.s32.totalorder %s918_s18, 0 }
   0x9   : > { %p1526_p2 = scmp.eq.s32.totalorder %s918_s18, 1  ;;  %p136_p3 = scmp.eq.s32.totalorder %s919_s19, 1 }
   0xa   : > { %s1799_s20 = scalar_select %p1522_p1, 1, 0 }
   0xb   : > { %s1800_s21 = scalar_select %p1526_p2, 1, 0 }
   0xc   : > { %p1532_p4 = por %p1522_p1, %p52_p0  ;;  %p920_p5 = scmp.ge.s32.totalorder %s1459_s17, 1 }
   0xd   : > { %p1537_p6 = por %p136_p3, %p52_p0  ;;  %p143_p7 = scmp.lt.s32.totalorder %s1459_s17, 3 }
   0xe   : > { %s1801_s22 = scalar_select %p1532_p4, 1, 0 }
   0xf   : > { %s1802_s23 = scalar_select %p1537_p6, 1, 0 }
  0x10   : > { %p1542_p8 = pnand %p920_p5, %p143_p7  ;;  %s1461_s25 = smov [#allocation5]  }
  0x11   : > { %s157_s26 = sshll.u32 %s1461_s25, 4  ;;  %s32_s28 = sadd.s32 1, %s1455_s16  ;;  %s158_s26 = int_to_ptr.vmem [resolvable:$true] %s157_s26 }
  0x12   : > { %s1803_s24 = scalar_select %p1542_p8, 1, 0 }
  0x13   : > { %p1222_p9 = pneg %p1542_p8  ;;  %s1315_s4 = scalar_lea.hbm %s1792_s1, 1024 }
  0x14   : > { %p1316_p12 = scmp.ne.s32.totalorder %s1792_s1, %s1315_s4  ;;  %p1322_p5 = scmp.lt.u32.totalorder %s1315_s4, %s1792_s1 }
  0x15   : > { %p1551_p11 = pnand %p1222_p9, %p1522_p1 }
  0x17   : > { %p1317_p13 = pneg %p1551_p11 }
  0x19   : > { %p1318_p0 = pnand %p1317_p13, %p1316_p12 }
  0x1b   : > { %p1319_p3 = pneg %p1318_p0 }
  0x1d   : > { %p1324_p7 = pnand %p1322_p5, %p1319_p3 }
  0x1f   : > { %1327 = shalt.err (!%p1324_p7)
}
  0x20   : > { %s1328_s9 = scalar_lea.vmem %s158_s26, 1024  ;;  %p1336_p1 = scmp.lt.s32.totalorder %s158_s26, %s158_s26 }
  0x21   : > { %p1329_p9 = scmp.ne.s32.totalorder %s158_s26, %s1328_s9  ;;  %p1337_p4 = scmp.lt.s32.totalorder %s1328_s9, %s1328_s9 }
  0x23   : > { %p1331_p10 = pnand %p1329_p9, %p1317_p13  ;;  %p1338_p8 = por %p1337_p4, %p1336_p1 }
  0x25   : > { %p1332_p6 = pneg %p1331_p10 }
  0x27   : > { %p1339_p2 = pnand %p1338_p8, %p1332_p6 }
  0x29   : > { %1342 = shalt.err (!%p1339_p2)
}
  0x2a   : > { %s1462_s10 = smov 64   ;;  %s1463_s11 = smov 4  }
  0x2b   : > { %1225 = dma.hbm_to_vmem [thread:$0]  (!%p1551_p11), %s1792_s1, 1024, %s158_s26, [#allocation6], %s1462_s10, %s1462_s10, %s1463_s11  }
  0x2c   : > { %p34_p1 = scmp.ge.s32.totalorder %s32_s28, 2  ;;  %s39_s25 = sadd.s32 1, %s1447_s14 }
  0x2d   : > { %p46_p2 = scmp.ne.s32.totalorder %s1447_s14, %s1443_s13  ;;  %p47_p4 = scmp.eq.s32.totalorder %s1459_s17, 0 }
  0x2e   : > { %s1820_s28 = smov (%p34_p1, %s32_s28), 0  ;;  %p1806_p8 = scmp.ne.s32.totalorder %s1800_s21, 0 }
  0x2f   : > { %p1581_p6 = por %p47_p4, %p46_p2  ;;  %s36_s30 = ssub.s32 %s1455_s16, %s1820_s28 }
  0x30   : > { %p1587_p10 = por %p1806_p8, %p46_p2  ;;  %p1235_p12 = scmp.lt.s32.totalorder %s1459_s17, 2 }
  0x31   : > { %p37_p11 = scmp.eq.s32.totalorder %s36_s30, 0  ;;  %s177_s26 = sand.u32 1, %s1447_s14  }
  0x32   : > { %s924_s4 = sshll.u32 %s177_s26, 7  ;;  %s996_s6 = sshll.u32 %s1455_s16, 11 }
  0x33   : > { %s1596_s5 = scalar_select %p37_p11, %s1447_s14, %s39_s25  }
  0x34   : > { %s1602_s9 = scalar_lea.hbm %s1791_s0, %s996_s6  ;;  %s181_s21 = scalar_lea.vmem [#allocation2], %s924_s4 }
  0x35   : > { %s189_s18 = sshll.u32 %s181_s21, 4  ;;  %p1608_p13 = pnand %p1235_p12, %p1581_p6  ;;  %s1604_s18 = int_to_ptr.vmem [resolvable:$true] %s189_s18 }
  0x36   : > { %s1612_s25 = scalar_lea.sflag [#allocation3], %s177_s26  ;;  %s1343_s30 = scalar_lea.hbm %s1602_s9, 2048 }
  0x37   : > { %p1344_p0 = scmp.ne.s32.totalorder %s1602_s9, %s1343_s30  ;;  %p1345_p3 = pneg %p1608_p13 }
  0x38   : > { %s1348_s29 = scalar_lea.hbm %s1791_s0, 4096  ;;  %p1349_p9 = scmp.lt.u32.totalorder %s1602_s9, %s1791_s0 }
  0x39   : > { %p1346_p5 = pnand %p1345_p3, %p1344_p0  ;;  %p1350_p1 = scmp.lt.u32.totalorder %s1348_s29, %s1343_s30 }
  0x3a   : > { %p1352_p4 = scmp.lt.u32.totalorder %s1343_s30, %s1602_s9 }
  0x3b   : > { %p1347_p7 = pneg %p1346_p5  ;;  %p1351_p2 = por %p1350_p1, %p1349_p9 }
  0x3d   : > { %p1353_p6 = por %p1352_p4, %p1351_p2 }
  0x3f   : > { %p1354_p8 = pnand %p1353_p6, %p1347_p7 }
  0x41   : > { %1357 = shalt.err (!%p1354_p8)
}
  0x42   : > { %s1358_s26 = scalar_lea.vmem %s1604_s18, 2048  ;;  %s1464_s21 = smov [#allocation2]  }
  0x43   : > { %p1359_p12 = scmp.ne.s32.totalorder %s1604_s18, %s1358_s26  ;;  %s1363_s4 = sshll.u32 %s1464_s21, 4  ;;  %s1364_s4 = int_to_ptr.vmem [resolvable:$false] %s1363_s4 }
  0x44   : > { %s1365_s6 = scalar_lea.vmem %s1364_s4, 4096  ;;  %p1366_p5 = scmp.lt.s32.totalorder %s1604_s18, %s1364_s4 }
  0x45   : > { %p1361_p11 = pnand %p1359_p12, %p1345_p3  ;;  %p1367_p9 = scmp.lt.s32.totalorder %s1365_s6, %s1358_s26 }
  0x47   : > { %p1362_p0 = pneg %p1361_p11  ;;  %p1368_p1 = por %p1367_p9, %p1366_p5 }
  0x49   : > { %p1369_p2 = pnand %p1368_p1, %p1362_p0 }
  0x4b   : > { %1372 = shalt.err (!%p1369_p2)
}
  0x4c   : > { %1229 = dma.hbm_to_vmem [thread:$0]  (!%p1608_p13), %s1602_s9, 2048, %s1604_s18, %s1612_s25, %s1462_s10, %s1462_s10, %s1463_s11  }
  0x4d   : > { %p1809_p3 = scmp.ne.s32.totalorder %s1803_s24, 0 }
  0x4e   : > { %s1646_s30 = sand.u32 (!%p1809_p3), 1, %s1443_s13   ;;  %p1810_p7 = scmp.ne.s32.totalorder (!%p1809_p3), %s1801_s22, 0 }
  0x4f   : > { %201 = sbr.rel (%p1809_p3) target bundleno = 383 (0x17f), region = 32  ;;  %s929_s29 = sshll.u32 (!%p1809_p3), %s1646_s30, 7 }
  0x50   : > { %s204_s7 = scalar_lea.sflag (!%p1809_p3), [#allocation3], %s1646_s30  ;;  %s1652_s19 = scalar_lea.vmem (!%p1809_p3), [#allocation2], %s929_s29 }
  0x56   : > { %1426 = dma.done.wait (%p1810_p7), %s204_s7, 2048  }
  0x57   : > { %1428 = vsyncadd (%p1810_p7), %s204_s7, 4294965248  ;;  %p1811_p13 = scmp.ne.s32.totalorder %s1799_s20, 0 }
  0x59   : > { %1430 = dma.done.wait (%p1811_p13), [#allocation6], 1024  }
  0x5a   : > { %1432 = vsyncadd (%p1811_p13), [#allocation6], 4294966272  ;;  %v1291_v0 = vld [vmem:[#allocation5] sm:$0xff]   ;;  %v1292_v1 = vld [vmem:[#allocation5 + $0x8] sm:$0xff]   ;;  %s1693_s24 = scalar_lea.vmem [#allocation7], %s929_s29  ;;  %s1030_s10 = sshll.u32 %s1451_s15, 11 }
  0x5b   : > { %1150 = vmatprep.subr.bf16.mxu0 %v1291_v0  ;;  %1198 = vmatprep.subr.bf16.mxu1 %v1291_v0  ;;  %v1293_v2 = vld [vmem:[#allocation5 + $0x10] sm:$0xff]   ;;  %v1294_v3 = vld [vmem:[#allocation5 + $0x18] sm:$0xff]   ;;  %v1299_v4 = vld [vmem:[%s1652_s19] sm:$0xff]   ;;  %s811_s11 = sshll.u32 %s1693_s24, 4  ;;  %s1736_s15 = scalar_lea.hbm %s1794_s3, %s1030_s10  ;;  %s1738_s11 = int_to_ptr.vmem [resolvable:$true] %s811_s11 }
  0x5c   : > { %1151 = vmatpush3.bf16.msra.mxu0 %v1291_v0  ;;  %1206 = vmatpush3.bf16.msra.mxu1 %v1291_v0  ;;  %v1300_v5 = vld [vmem:[%s1652_s19 + $0x40] sm:$0xff]   ;;  %v1296_v7 = vld [vmem:[#allocation5 + $0x28] sm:$0xff]   ;;  %v1297_v8 = vld [vmem:[#allocation5 + $0x30] sm:$0xff]   ;;  %s796_s25 = scalar_lea.sflag [#allocation4], %s1646_s30  ;;  %s1373_s8 = scalar_lea.vmem %s1738_s11, 2048 }
  0x5d   : > { %1152 = vmatprep.subr.bf16.mxu0 %v1292_v1  ;;  %1199 = vmatprep.subr.bf16.mxu1 %v1292_v1  ;;  %v1295_v6 = vld [vmem:[#allocation5 + $0x20] sm:$0xff]   ;;  %v1298_v9 = vld [vmem:[#allocation5 + $0x38] sm:$0xff]   ;;  %v1301_v10 = vld [vmem:[%s1652_s19 + $0x8] sm:$0xff]   ;;  %p1374_p4 = scmp.ne.s32.totalorder %s1738_s11, %s1373_s8  ;;  %s1465_s26 = smov [#allocation7]  }
  0x5e   : > { %1166 = vmatprep.mubr.bf16.mxu0 %v1299_v4  ;;  %1182 = vmatprep.mubr.bf16.mxu1 %v1300_v5  ;;  %v1302_v11 = vld [vmem:[%s1652_s19 + $0x48] sm:$0xff]   ;;  %v1303_v12 = vld [vmem:[%s1652_s19 + $0x10] sm:$0xff]   ;;  %v1305_v14 = vld [vmem:[%s1652_s19 + $0x18] sm:$0xff]   ;;  %s1377_s21 = sshll.u32 %s1465_s26, 4  ;;  %s1378_s21 = int_to_ptr.vmem [resolvable:$false] %s1377_s21 }
  0x5f   : > { %v1304_v13 = vld [vmem:[%s1652_s19 + $0x50] sm:$0xff]   ;;  %v1306_v15 = vld [vmem:[%s1652_s19 + $0x58] sm:$0xff]   ;;  %v1307_v16 = vld [vmem:[%s1652_s19 + $0x20] sm:$0xff]   ;;  %p1375_p6 = pnand %p1374_p4, %p1587_p10  ;;  %s1379_s4 = scalar_lea.vmem %s1378_s21, 4096 }
  0x60   : > { %1153 = vmatpush3.bf16.msra.mxu0 %v1292_v1  ;;  %1207 = vmatpush3.bf16.msra.mxu1 %v1292_v1  ;;  %v1308_v17 = vld [vmem:[%s1652_s19 + $0x60] sm:$0xff]   ;;  %v1309_v18 = vld [vmem:[%s1652_s19 + $0x28] sm:$0xff]   ;;  %v1311_v20 = vld [vmem:[%s1652_s19 + $0x30] sm:$0xff]   ;;  %p1380_p12 = scmp.lt.s32.totalorder %s1738_s11, %s1378_s21  ;;  %p1381_p11 = scmp.lt.s32.totalorder %s1379_s4, %s1373_s8 }
  0x61   : > { %1154 = vmatprep.subr.bf16.mxu0 %v1293_v2  ;;  %1200 = vmatprep.subr.bf16.mxu1 %v1293_v2  ;;  %v1310_v19 = vld [vmem:[%s1652_s19 + $0x68] sm:$0xff]   ;;  %v1312_v21 = vld [vmem:[%s1652_s19 + $0x70] sm:$0xff]   ;;  %v1313_v22 = vld [vmem:[%s1652_s19 + $0x38] sm:$0xff]   ;;  %p1376_p8 = pneg %p1375_p6 }
  0x62   : > { %v1314_v23 = vld [vmem:[%s1652_s19 + $0x78] sm:$0xff]   ;;  %v1681_v24 = vld [vmem:[%s1793_s2] ss:$0 sm:$0xff]  ;;  %p1382_p0 = por %p1381_p11, %p1380_p12 }
  0x64   : > { %1155 = vmatpush3.bf16.msra.mxu0 %v1293_v2  ;;  %1208 = vmatpush3.bf16.msra.mxu1 %v1293_v2  ;;  %p1383_p5 = pnand %p1382_p0, %p1376_p8 }
  0x65   : > { %1156 = vmatprep.subr.bf16.mxu0 %v1294_v3  ;;  %1201 = vmatprep.subr.bf16.mxu1 %v1294_v3 }
  0x68   : > { %1157 = vmatpush3.bf16.msra.mxu0 %v1294_v3  ;;  %1209 = vmatpush3.bf16.msra.mxu1 %v1294_v3 }
  0x69   : > { %1158 = vmatprep.subr.bf16.mxu0 %v1295_v6  ;;  %1202 = vmatprep.subr.bf16.mxu1 %v1295_v6 }
  0x6c   : > { %1159 = vmatpush3.bf16.msra.mxu0 %v1295_v6  ;;  %1210 = vmatpush3.bf16.msra.mxu1 %v1295_v6 }
  0x6d   : > { %1160 = vmatprep.subr.bf16.mxu0 %v1296_v7  ;;  %1203 = vmatprep.subr.bf16.mxu1 %v1296_v7 }
  0x70   : > { %1161 = vmatpush3.bf16.msra.mxu0 %v1296_v7  ;;  %1211 = vmatpush3.bf16.msra.mxu1 %v1296_v7 }
  0x71   : > { %1162 = vmatprep.subr.bf16.mxu0 %v1297_v8  ;;  %1204 = vmatprep.subr.bf16.mxu1 %v1297_v8 }
  0x74   : > { %1163 = vmatpush3.bf16.msra.mxu0 %v1297_v8  ;;  %1212 = vmatpush3.bf16.msra.mxu1 %v1297_v8 }
  0x75   : > { %1164 = vmatprep.subr.bf16.mxu0 %v1298_v9  ;;  %1205 = vmatprep.subr.bf16.mxu1 %v1298_v9 }
  0x78   : > { %1165 = vmatpush3.bf16.msra.mxu0 %v1298_v9  ;;  %1213 = vmatpush3.bf16.msra.mxu1 %v1298_v9 }
  0x7b   : > { %1167 = vmatmul.mubr.bf16.vlgmr.msra.gmra.mrb[0].mxu0 %v1301_v10  ;;  %1183 = vmatmul.mubr.bf16.vlgmr.msra.gmra.mrb[0].mxu1 %v1302_v11 }
  0x7c   : > { %1170 = vmatprep.mubr.bf16.mxu0 %v1303_v12  ;;  %1186 = vmatprep.mubr.bf16.mxu1 %v1304_v13 }
  0x83   : > { %1171 = vmatmul.mubr.bf16.gmra.mrb[4].mxu0 %v1305_v14  ;;  %1187 = vmatmul.mubr.bf16.gmra.mrb[4].mxu1 %v1306_v15 }
  0x84   : > { %1174 = vmatprep.mubr.bf16.mxu0 %v1307_v16  ;;  %1190 = vmatprep.mubr.bf16.mxu1 %v1308_v17 }
  0x8b   : > { %1175 = vmatmul.mubr.bf16.gmra.mrb[8].mxu0 %v1309_v18  ;;  %1191 = vmatmul.mubr.bf16.gmra.mrb[8].mxu1 %v1310_v19 }
  0x8c   : > { %1178 = vmatprep.mubr.bf16.mxu0 %v1311_v20  ;;  %1194 = vmatprep.mubr.bf16.mxu1 %v1312_v21 }
  0x93   : > { %1179 = vmatmul.mubr.bf16.gmra.mrb[12].mxu0 %v1313_v22  ;;  %1195 = vmatmul.mubr.bf16.gmra.mrb[12].mxu1 %v1314_v23 }
 0x14e   : > { %v1168_v25 = vpop.f32.mrb[0].mxu0  ;;  %v1184_v26 = vpop.f32.mrb[0].mxu1 }
 0x14f   : > { %v485_v27 = vadd.f32 %v1168_v25, %v1681_v24  ;;  %v549_v28 = vadd.f32 %v1184_v26, %v1681_v24  ;;  %v476_v29 = vpop.f32.mrb[1].mxu0  ;;  %v540_v30 = vpop.f32.mrb[1].mxu1 }
 0x150   : > { %v477_v31 = vadd.f32 %v1681_v24, %v476_v29  ;;  %v541_v32 = vadd.f32 %v1681_v24, %v540_v30  ;;  %v1169_v33 = vpop.f32.mrb[2].mxu0  ;;  %v1185_v34 = vpop.f32.mrb[2].mxu1 }
 0x151   : > { %v488_v35 = vadd.f32 %v1169_v33, %v1681_v24  ;;  %v552_v36 = vadd.f32 %v1185_v34, %v1681_v24  ;;  %v479_v37 = vpop.f32.mrb[3].mxu0  ;;  %v543_v38 = vpop.f32.mrb[3].mxu1  ;;  %v605_v41 = vmax.f32 %v485_v27, 0.0  ;;  %v621_v42 = vmax.f32 %v549_v28, 0.0 }
 0x152   : > { %v480_v39 = vadd.f32 %v1681_v24, %v479_v37  ;;  %v544_v40 = vadd.f32 %v1681_v24, %v543_v38  ;;  %v603_v45 = vmax.f32 %v477_v31, 0.0  ;;  %v619_v46 = vmax.f32 %v541_v32, 0.0 }
 0x153   : > { %v606_v43 = vmax.f32 %v488_v35, 0.0  ;;  %v622_v44 = vmax.f32 %v552_v36, 0.0 }
 0x154   : > { %v604_v47 = vmax.f32 %v480_v39, 0.0  ;;  %v620_v48 = vmax.f32 %v544_v40, 0.0 }
 0x155   : > { %v1039_v49 = vpack.c.bf16 %v606_v43, %v605_v41  ;;  %v1079_v50 = vpack.c.bf16 %v622_v44, %v621_v42 }
 0x156   : > { %v1034_v51 = vpack.c.bf16 %v604_v47, %v603_v45  ;;  %v1074_v52 = vpack.c.bf16 %v620_v48, %v619_v46  ;;  %v1172_v53 = vpop.f32.mrb[4].mxu0  ;;  %v1188_v54 = vpop.f32.mrb[4].mxu1 }
 0x157   : > { %1111 = vst [vmem:[%s1693_s24 + $0x8] sm:$0xff] %v1039_v49   ;;  %1119 = vst [vmem:[%s1693_s24 + $0x48] sm:$0xff] %v1079_v50   ;;  %v501_v55 = vadd.f32 %v1172_v53, %v1681_v24  ;;  %v565_v56 = vadd.f32 %v1188_v54, %v1681_v24  ;;  %v492_v57 = vpop.f32.mrb[5].mxu0  ;;  %v556_v58 = vpop.f32.mrb[5].mxu1 }
 0x158   : > { %1035 = vst [vmem:[%s1693_s24] sm:$0xff] %v1034_v51   ;;  %1118 = vst [vmem:[%s1693_s24 + $0x40] sm:$0xff] %v1074_v52   ;;  %v493_v59 = vadd.f32 %v1681_v24, %v492_v57  ;;  %v557_v60 = vadd.f32 %v1681_v24, %v556_v58  ;;  %v1173_v61 = vpop.f32.mrb[6].mxu0  ;;  %v1189_v62 = vpop.f32.mrb[6].mxu1 }
 0x159   : > { %v504_v63 = vadd.f32 %v1173_v61, %v1681_v24  ;;  %v568_v0 = vadd.f32 %v1189_v62, %v1681_v24  ;;  %v495_v1 = vpop.f32.mrb[7].mxu0  ;;  %v559_v2 = vpop.f32.mrb[7].mxu1  ;;  %v609_v5 = vmax.f32 %v501_v55, 0.0  ;;  %v625_v6 = vmax.f32 %v565_v56, 0.0 }
 0x15a   : > { %v496_v3 = vadd.f32 %v1681_v24, %v495_v1  ;;  %v560_v4 = vadd.f32 %v1681_v24, %v559_v2  ;;  %v607_v9 = vmax.f32 %v493_v59, 0.0  ;;  %v623_v10 = vmax.f32 %v557_v60, 0.0 }
 0x15b   : > { %v610_v7 = vmax.f32 %v504_v63, 0.0  ;;  %v626_v8 = vmax.f32 %v568_v0, 0.0 }
 0x15c   : > { %v608_v11 = vmax.f32 %v496_v3, 0.0  ;;  %v624_v12 = vmax.f32 %v560_v4, 0.0 }
 0x15d   : > { %v1049_v13 = vpack.c.bf16 %v610_v7, %v609_v5  ;;  %v1089_v14 = vpack.c.bf16 %v626_v8, %v625_v6 }
 0x15e   : > { %v1044_v15 = vpack.c.bf16 %v608_v11, %v607_v9  ;;  %v1084_v16 = vpack.c.bf16 %v624_v12, %v623_v10  ;;  %v1176_v17 = vpop.f32.mrb[8].mxu0  ;;  %v1192_v18 = vpop.f32.mrb[8].mxu1 }
 0x15f   : > { %1113 = vst [vmem:[%s1693_s24 + $0x18] sm:$0xff] %v1049_v13   ;;  %1121 = vst [vmem:[%s1693_s24 + $0x58] sm:$0xff] %v1089_v14   ;;  %v517_v19 = vadd.f32 %v1176_v17, %v1681_v24  ;;  %v581_v20 = vadd.f32 %v1192_v18, %v1681_v24  ;;  %v508_v21 = vpop.f32.mrb[9].mxu0  ;;  %v572_v22 = vpop.f32.mrb[9].mxu1 }
 0x160   : > { %1112 = vst [vmem:[%s1693_s24 + $0x10] sm:$0xff] %v1044_v15   ;;  %1120 = vst [vmem:[%s1693_s24 + $0x50] sm:$0xff] %v1084_v16   ;;  %v509_v23 = vadd.f32 %v1681_v24, %v508_v21  ;;  %v573_v25 = vadd.f32 %v1681_v24, %v572_v22  ;;  %v1177_v26 = vpop.f32.mrb[10].mxu0  ;;  %v1193_v27 = vpop.f32.mrb[10].mxu1 }
 0x161   : > { %v520_v28 = vadd.f32 %v1177_v26, %v1681_v24  ;;  %v584_v29 = vadd.f32 %v1193_v27, %v1681_v24  ;;  %v511_v30 = vpop.f32.mrb[11].mxu0  ;;  %v575_v31 = vpop.f32.mrb[11].mxu1  ;;  %v613_v34 = vmax.f32 %v517_v19, 0.0  ;;  %v629_v35 = vmax.f32 %v581_v20, 0.0 }
 0x162   : > { %v512_v32 = vadd.f32 %v1681_v24, %v511_v30  ;;  %v576_v33 = vadd.f32 %v1681_v24, %v575_v31  ;;  %v611_v38 = vmax.f32 %v509_v23, 0.0  ;;  %v627_v39 = vmax.f32 %v573_v25, 0.0 }
 0x163   : > { %v614_v36 = vmax.f32 %v520_v28, 0.0  ;;  %v630_v37 = vmax.f32 %v584_v29, 0.0 }
 0x164   : > { %v612_v40 = vmax.f32 %v512_v32, 0.0  ;;  %v628_v41 = vmax.f32 %v576_v33, 0.0 }
 0x165   : > { %v1059_v42 = vpack.c.bf16 %v614_v36, %v613_v34  ;;  %v1099_v43 = vpack.c.bf16 %v630_v37, %v629_v35 }
 0x166   : > { %v1054_v44 = vpack.c.bf16 %v612_v40, %v611_v38  ;;  %v1094_v45 = vpack.c.bf16 %v628_v41, %v627_v39  ;;  %v1180_v46 = vpop.f32.mrb[12].mxu0  ;;  %v1196_v47 = vpop.f32.mrb[12].mxu1 }
 0x167   : > { %1115 = vst [vmem:[%s1693_s24 + $0x28] sm:$0xff] %v1059_v42   ;;  %1123 = vst [vmem:[%s1693_s24 + $0x68] sm:$0xff] %v1099_v43   ;;  %v533_v48 = vadd.f32 %v1180_v46, %v1681_v24  ;;  %v597_v49 = vadd.f32 %v1196_v47, %v1681_v24  ;;  %v524_v50 = vpop.f32.mrb[13].mxu0  ;;  %v588_v51 = vpop.f32.mrb[13].mxu1 }
 0x168   : > { %1114 = vst [vmem:[%s1693_s24 + $0x20] sm:$0xff] %v1054_v44   ;;  %1122 = vst [vmem:[%s1693_s24 + $0x60] sm:$0xff] %v1094_v45   ;;  %v525_v52 = vadd.f32 %v1681_v24, %v524_v50  ;;  %v589_v53 = vadd.f32 %v1681_v24, %v588_v51  ;;  %v1181_v54 = vpop.f32.mrb[14].mxu0  ;;  %v1197_v55 = vpop.f32.mrb[14].mxu1 }
 0x169   : > { %v536_v56 = vadd.f32 %v1181_v54, %v1681_v24  ;;  %v600_v57 = vadd.f32 %v1197_v55, %v1681_v24  ;;  %v527_v58 = vpop.f32.mrb[15].mxu0  ;;  %v591_v59 = vpop.f32.mrb[15].mxu1  ;;  %v617_v62 = vmax.f32 %v533_v48, 0.0  ;;  %v633_v63 = vmax.f32 %v597_v49, 0.0 }
 0x16a   : > { %v528_v60 = vadd.f32 %v1681_v24, %v527_v58  ;;  %v592_v61 = vadd.f32 %v1681_v24, %v591_v59  ;;  %v615_v2 = vmax.f32 %v525_v52, 0.0  ;;  %v631_v3 = vmax.f32 %v589_v53, 0.0 }
 0x16b   : > { %v618_v0 = vmax.f32 %v536_v56, 0.0  ;;  %v634_v1 = vmax.f32 %v600_v57, 0.0 }
 0x16c   : > { %v616_v4 = vmax.f32 %v528_v60, 0.0  ;;  %v632_v5 = vmax.f32 %v592_v61, 0.0 }
 0x16d   : > { %v1069_v6 = vpack.c.bf16 %v618_v0, %v617_v62  ;;  %v1109_v7 = vpack.c.bf16 %v634_v1, %v633_v63 }
 0x16e   : > { %v1064_v24 = vpack.c.bf16 %v616_v4, %v615_v2  ;;  %v1104_v8 = vpack.c.bf16 %v632_v5, %v631_v3 }
 0x16f   : > { %1117 = vst [vmem:[%s1693_s24 + $0x38] sm:$0xff] %v1069_v6   ;;  %1125 = vst [vmem:[%s1693_s24 + $0x78] sm:$0xff] %v1109_v7  }
 0x170   : > { %1116 = vst [vmem:[%s1693_s24 + $0x30] sm:$0xff] %v1064_v24   ;;  %1124 = vst [vmem:[%s1693_s24 + $0x70] sm:$0xff] %v1104_v8  }
 0x171   : > { %1386 = shalt.err (!%p1383_p5)
}
 0x172   : > { %s1387_s6 = scalar_lea.hbm %s1736_s15, 2048  ;;  %s1391_s19 = scalar_lea.hbm %s1794_s3, 4096 }
 0x173   : > { %p1388_p9 = scmp.ne.s32.totalorder %s1736_s15, %s1387_s6  ;;  %p1392_p3 = scmp.lt.u32.totalorder %s1736_s15, %s1794_s3 }
 0x174   : > { %p1393_p7 = scmp.lt.u32.totalorder %s1391_s19, %s1387_s6  ;;  %p1395_p4 = scmp.lt.u32.totalorder %s1387_s6, %s1736_s15 }
 0x175   : > { %p1389_p1 = pnand %p1388_p9, %p1587_p10 }
 0x176   : > { %p1394_p13 = por %p1393_p7, %p1392_p3 }
 0x177   : > { %p1390_p2 = pneg %p1389_p1 }
 0x178   : > { %p1396_p6 = por %p1395_p4, %p1394_p13 }
 0x17a   : > { %p1397_p8 = pnand %p1396_p6, %p1390_p2 }
 0x17c   : > { %1400 = shalt.err (!%p1397_p8)
}
 0x17d   : > { %s1466_s24 = smov 64   ;;  %s1467_s10 = smov 4  }
 0x17e   : > { %1220 = dma.vmem_to_hbm [thread:$0]  (%p1587_p10), %s1738_s11, 2048, %s1736_s15, %s796_s25, %s1466_s24, %s1466_s24, %s1467_s10  }
 0x17f PF: > { %s826_s9 = sand.u32 1, %s1439_s12   ;;  %p1812_p12 = scmp.ne.s32.totalorder %s1802_s23, 0 }
 0x180   : > { %p1813_p11 = scmp.ge.s32.totalorder %s1459_s17, 2  ;;  %s827_s18 = scalar_lea.sflag [#allocation4], %s826_s9 }
 0x182   : > { %p1231_p0 = pnand %p1813_p11, %p1812_p12 }
 0x184   : > { %1434 = dma.done.wait (!%p1231_p0), %s827_s18, 2048  }
 0x185   : > { %1436 = vsyncadd (!%p1231_p0), %s827_s18, 4294965248  ;;  %s20_s17 = sadd.s32 1, %s1459_s17   ;;  %s1814_s12 = smov %s1443_s13 }
 0x186   : > { %p17_p5 = scmp.ge.s32.totalorder %s20_s17, 4   ;;  %s1815_s13 = smov %s1447_s14 }
 0x187   : > { %s1816_s14 = smov %s1596_s5  ;;  %s1817_s15 = smov %s1455_s16 }
 0x188   : > { %s1818_s16 = smov %s1820_s28  ;;  %19 = sbr.rel (!%p17_p5) target bundleno = 7 (0x7), region = 85 }
 0x18f   :  { %832 = vsyncpa [#allocation3], 1 }
 0x190   :  { %834 = vsyncpa [#allocation3 + $0x1], 1 }
 0x191   :  { %835 = vsyncpa [#allocation6], 1 }
 0x192   :  { %836 = vsyncpa [#allocation4], 1 }
 0x193   :  { %838 = vsyncpa [#allocation4 + $0x1], 1 }

</bundles_post_ra>
